<compile_context>
chip_gen: v5e
topology: v5e:2x2
jax: 0.10.0
libtpu: 0.0.40
codegen_flags: <defaults>
</compile_context>

<pallas_src>
import jax
import jax.numpy as jnp
from jax.experimental import pallas as pl
from jax.experimental.pallas import tpu as pltpu

LANE = 128


def _round_up(x, m):
    return (x + m - 1) // m * m


def _cdiv(a, b):
    return -(-a // b)


def _vmem_limit_bytes():
    try:
        cap = pltpu.get_tpu_info().vmem_capacity_bytes
        return int(min(48 * 1024 * 1024, 0.75 * cap))
    except Exception:
        return 32 * 1024 * 1024


def _matmul_bn_relu_kernel(x_ref, w_ref, shift_ref, o_ref):
    """One (batch, cout-tile, row-tile) grid step.

    x_ref:     (1, TM, Kp)   im2col'd activations, bf16
    w_ref:     (Kp, TN)      BN-scale-folded weights, bf16
    shift_ref: (1, TN)       folded BN shift, f32
    o_ref:     (1, TM, TN)   output tile, bf16
    """
    acc = jnp.dot(x_ref[0], w_ref[...], preferred_element_type=jnp.float32)
    y = jnp.maximum(acc + shift_ref[...], 0.0)
    o_ref[0] = y.astype(o_ref.dtype)


def basic_conv2d(x_nchw, weight, gamma, beta, running_mean, running_var,
                 *, eps=1e-3, stride=1, padding=1):
    """BasicConv2d forward (inference BatchNorm). x_nchw: (N, Cin, H, W) f32."""
    N, Cin, H, W = x_nchw.shape
    Cout, Cin_w, KH, KW = weight.shape
    assert Cin == Cin_w

    Hp, Wp = H + 2 * padding, W + 2 * padding
    H_out = (Hp - KH) // stride + 1
    W_out = (Wp - KW) // stride + 1
    S = H_out * W_out

    K = KH * KW * Cin
    K_pad = _round_up(K, LANE)
    # TODO(synk): for large Cin (K_pad >> 128) a direct-conv per-tap path would
    # avoid the KH*KW-fold im2col HBM inflation; small-Cin layers pay nothing
    # here since Cin would have been lane-padded to 128 anyway.

    cout_pad = _round_up(Cout, LANE)
    TN = 256 if cout_pad % 256 == 0 else LANE
    n_cout = cout_pad // TN

    n_m = _cdiv(S, 256)
    TM = _round_up(_cdiv(S, n_m), 8)      # balanced row tile, multiple of 8
    S_pad = TM * n_m

    # ---- plain-JAX glue: layout, im2col packing, BN folding -----------------
    # TODO(synk): the boundary NCHW<->NHWC transposes disappear in an NHWC
    # end-to-end model; kept only to match the PyTorch interface.
    x_nhwc = jnp.transpose(x_nchw, (0, 2, 3, 1))
    x_p = jnp.pad(x_nhwc,
                  ((0, 0), (padding, padding), (padding, padding), (0, 0)))

    taps = []
    for kh in range(KH):
        for kw in range(KW):
            taps.append(x_p[:, kh:kh + (H_out - 1) * stride + 1:stride,
                            kw:kw + (W_out - 1) * stride + 1:stride, :])
    # (N, H_out, W_out, KH*KW, Cin) -> (N, S, K); patch order is (kh, kw, cin)
    x_col = jnp.stack(taps, axis=3).reshape(N, S, K)
    x_col = jnp.pad(x_col, ((0, 0), (0, S_pad - S), (0, K_pad - K)))
    x_col = x_col.astype(jnp.bfloat16)

    # BN(eval) folding: y = conv(x) * scale + shift; scale folded into weights.
    scale = gamma / jnp.sqrt(running_var + eps)
    shift = (beta - running_mean * scale).astype(jnp.float32)
    # (Cout, Cin, KH, KW) -> (KH, KW, Cin, Cout) -> (K, Cout): matches x_col.
    w2d = jnp.transpose(weight, (2, 3, 1, 0)).reshape(K, Cout) * scale[None, :]
    w2d = jnp.pad(w2d, ((0, K_pad - K), (0, cout_pad - Cout)))
    w2d = w2d.astype(jnp.bfloat16)
    shift = jnp.pad(shift, (0, cout_pad - Cout)).reshape(1, cout_pad)

    out_col = pl.pallas_call(
        _matmul_bn_relu_kernel,
        out_shape=jax.ShapeDtypeStruct((N, S_pad, cout_pad), jnp.bfloat16),
        grid_spec=pltpu.PrefetchScalarGridSpec(
            num_scalar_prefetch=0,
            # Row tiles innermost: weight/shift tiles (depend only on c) stay
            # VMEM-resident across all row tiles of a given cout tile.
            grid=(N, n_cout, n_m),
            in_specs=[
                pl.BlockSpec((1, TM, K_pad), lambda n, c, m: (n, m, 0)),
                pl.BlockSpec((K_pad, TN), lambda n, c, m: (0, c)),
                pl.BlockSpec((1, TN), lambda n, c, m: (0, c)),
            ],
            out_specs=pl.BlockSpec((1, TM, TN), lambda n, c, m: (n, m, c)),
        ),
        compiler_params=pltpu.CompilerParams(
            dimension_semantics=("parallel", "parallel", "parallel"),
            vmem_limit_bytes=_vmem_limit_bytes(),
        ),
    )(x_col, w2d, shift)

    out = out_col[:, :S, :Cout].reshape(N, H_out, W_out, Cout)
    return jnp.transpose(out, (0, 3, 1, 2)).astype(jnp.float32)


if __name__ == "__main__":
    # Small, deterministic config: BasicConv2d(4, 8, kernel_size=3, padding=1)
    N, Cin, H, W = 2, 4, 16, 16
    Cout, KH, KW = 8, 3, 3

    key = jax.random.PRNGKey(0)
    kx, kw_, kg, kb = jax.random.split(key, 4)

    x = jax.random.normal(kx, (N, Cin, H, W), dtype=jnp.float32)
    weight = jax.random.normal(kw_, (Cout, Cin, KH, KW), dtype=jnp.float32) * 0.1
    gamma = 1.0 + 0.1 * jax.random.normal(kg, (Cout,), dtype=jnp.float32)
    beta = 0.1 * jax.random.normal(kb, (Cout,), dtype=jnp.float32)
    running_mean = jnp.zeros((Cout,), dtype=jnp.float32)
    running_var = jnp.ones((Cout,), dtype=jnp.float32)

    out = basic_conv2d(x, weight, gamma, beta, running_mean, running_var,
                       eps=1e-3, stride=1, padding=1)
    jax.block_until_ready(out)

    # Pure-JAX f32 reference: conv (stride 1, pad 1) + BN(eval) + ReLU.
    # Tolerance loosened vs. an all-f32 kernel: matmul operands, folded
    # BN-scale weights, and the output writeback are bf16 (accumulation and
    # the add/ReLU epilogue stay f32).
    ref = jax.lax.conv_general_dilated(
        x, weight, window_strides=(1, 1), padding=((1, 1), (1, 1)),
        dimension_numbers=("NCHW", "OIHW", "NCHW"))
    s = (gamma / jnp.sqrt(running_var + 1e-3)).reshape(1, Cout, 1, 1)
    b = (beta - running_mean * gamma / jnp.sqrt(running_var + 1e-3)
         ).reshape(1, Cout, 1, 1)
    ref = jnp.maximum(ref * s + b, 0.0)

    assert out.shape == (N, Cout, H, W)
    assert jnp.allclose(out, ref, atol=5e-2, rtol=5e-2)

    print("KERNEL_OK")
</pallas_src>

<mosaic_0001>
module attributes {stable_mosaic.version = 11 : i64} {
  func.func @_matmul_bn_relu_kernel(%arg0: i32, %arg1: i32, %arg2: i32, %arg3: memref<1x256x128xbf16, #tpu.memory_space<vmem>>, %arg4: memref<128x128xbf16, #tpu.memory_space<vmem>>, %arg5: memref<1x128xf32, #tpu.memory_space<vmem>>, %arg6: memref<1x256x128xbf16, #tpu.memory_space<vmem>>) attributes {dimension_semantics = [#tpu.dimension_semantics<parallel>, #tpu.dimension_semantics<parallel>, #tpu.dimension_semantics<parallel>], iteration_bounds = array<i64: 2, 1, 1>, scalar_prefetch = 0 : i64, scratch_operands = 0 : i64, tpu.core_type = #tpu.core_type<tc>, window_params = [{transform_indices = @transform_0, window_bounds = array<i64: 1, 256, 128>}, {transform_indices = @transform_1, window_bounds = array<i64: 128, 128>}, {transform_indices = @transform_2, window_bounds = array<i64: 1, 128>}, {transform_indices = @transform_3, window_bounds = array<i64: 1, 256, 128>}]} {
    %c0 = arith.constant 0 : index
    %c0_0 = arith.constant 0 : index
    %c0_1 = arith.constant 0 : index
    %0 = vector.load %arg3[%c0, %c0_0, %c0_1] : memref<1x256x128xbf16, #tpu.memory_space<vmem>>, vector<1x256x128xbf16>
    %1 = vector.shape_cast %0 : vector<1x256x128xbf16> to vector<256x128xbf16>
    %c0_2 = arith.constant 0 : index
    %c0_3 = arith.constant 0 : index
    %2 = vector.load %arg4[%c0_2, %c0_3] : memref<128x128xbf16, #tpu.memory_space<vmem>>, vector<128x128xbf16>
    %cst = arith.constant dense<0.000000e+00> : vector<256x128xf32>
    %3 = tpu.matmul %1, %2, %cst {dimension_numbers = #tpu.dot_dimension_numbers<[1], [0], [0], [1], [0, 0, 1, 1], [], []>} : vector<256x128xbf16>, vector<128x128xbf16>, vector<256x128xf32> -> vector<256x128xf32>
    %c0_4 = arith.constant 0 : index
    %c0_5 = arith.constant 0 : index
    %4 = vector.load %arg5[%c0_4, %c0_5] : memref<1x128xf32, #tpu.memory_space<vmem>>, vector<1x128xf32>
    %5 = vector.broadcast %4 : vector<1x128xf32> to vector<256x128xf32>
    %6 = arith.addf %3, %5 : vector<256x128xf32>
    %cst_6 = arith.constant 0.000000e+00 : f32
    %7 = vector.broadcast %cst_6 : f32 to vector<256x128xf32>
    %8 = arith.maximumf %6, %7 : vector<256x128xf32>
    %9 = arith.truncf %8 : vector<256x128xf32> to vector<256x128xbf16>
    %c0_7 = arith.constant 0 : index
    %c0_8 = arith.constant 0 : index
    %c0_9 = arith.constant 0 : index
    %10 = vector.load %arg6[%c0_7, %c0_8, %c0_9] : memref<1x256x128xbf16, #tpu.memory_space<vmem>>, vector<1x256x128xbf16>
    %11 = vector.shape_cast %10 : vector<1x256x128xbf16> to vector<256x128xbf16>
    %12 = vector.shape_cast %9 : vector<256x128xbf16> to vector<1x256x128xbf16>
    tpu.vector_store %arg6[%c0_7, %c0_8, %c0_9], %12 {strides = array<i32>} : memref<1x256x128xbf16, #tpu.memory_space<vmem>>, vector<1x256x128xbf16>,
    return
  }
  func.func @transform_0(%arg0: i32, %arg1: i32, %arg2: i32) -> (i32, i32, i32) {
    %c0_i32 = arith.constant 0 : i32
    %c0_i32_0 = arith.constant 0 : i32
    return %arg0, %arg2, %c0_i32 : i32, i32, i32
  }
  func.func @transform_1(%arg0: i32, %arg1: i32, %arg2: i32) -> (i32, i32) {
    %c0_i32 = arith.constant 0 : i32
    %c0_i32_0 = arith.constant 0 : i32
    return %c0_i32, %arg1 : i32, i32
  }
  func.func @transform_2(%arg0: i32, %arg1: i32, %arg2: i32) -> (i32, i32) {
    %c0_i32 = arith.constant 0 : i32
    %c0_i32_0 = arith.constant 0 : i32
    return %c0_i32, %arg1 : i32, i32
  }
  func.func @transform_3(%arg0: i32, %arg1: i32, %arg2: i32) -> (i32, i32, i32) {
    %c0_i32 = arith.constant 0 : i32
    return %arg0, %arg2, %arg1 : i32, i32, i32
  }
}

</mosaic_0001>

<bundles_post_ra>
// kernel: tpu_custom_call.1
= control target key start
LH: loop header
LB: loop body
LE: loop exit
PB: predicated region body
PF: predicated region fallthrough
CT: control target
= control target key end

     0   :  { %s1516_s0 = inlined_call_operand.hbm [shape: bf16[2,256,128], index: 0, kind: input, shape index: {}]   ;;  %s1517_s1 = inlined_call_operand.hbm [shape: bf16[128,128], index: 1, kind: input, shape index: {}]   ;;  %s1518_s2 = inlined_call_operand.vmem [shape: f32[1,128], index: 2, kind: input, shape index: {}]   ;;  %s1519_s3 = inlined_call_operand.hbm [shape: bf16[2,256,128], index: 3, kind: output, shape index: {}]  }
   0x1   :  { %1521 = sst [smem:[#allocation11_spill]] %s1517_s1 }
   0x2   :  { %8 = vsyncpa [#allocation3], 0 }
   0x3   :  { %10 = vsyncpa [#allocation3 + $0x1], 0 }
   0x4   :  { %11 = vsyncpa [#allocation6], 0 }
   0x5   :  { %12 = vsyncpa [#allocation4], 0 }
   0x6   :  { %14 = vsyncpa [#allocation4 + $0x1], 0  ;;  %s1283_s12 = smov 0   ;;  %s1285_s13 = smov 0  }
   0x7   :  { %s1287_s14 = smov 0   ;;  %s1289_s15 = smov 0  }
   0x8   :  { %s1291_s16 = smov 0   ;;  %s1293_s17 = smov 0  }
   0x9 LB: > { %s773_s18 = sadd.s32 4294967295, %s1256_s17   ;;  %s774_s19 = sadd.s32 4294967294, %s1256_s17   ;;  %s1256_s17 = sphi %s1293_s17, %s20_s17   ;;  %s1252_s16 = sphi %s1291_s16, %s1535_s16   ;;  %s1248_s15 = sphi %s1289_s15, %s1534_s15   ;;  %s1244_s14 = sphi %s1287_s14, %s1533_s14   ;;  %s1240_s13 = sphi %s1285_s13, %s1532_s13   ;;  %s1236_s12 = sphi %s1283_s12, %s1531_s12  }
   0xa   : > { %p61_p0 = scmp.ne.s32.totalorder %s1240_s13, %s1236_s12  ;;  %p1317_p1 = scmp.eq.s32.totalorder %s773_s18, 0 }
   0xb   : > { %p1321_p2 = scmp.eq.s32.totalorder %s773_s18, 1  ;;  %p147_p3 = scmp.eq.s32.totalorder %s774_s19, 1 }
   0xc   : > { %p1327_p4 = por %p1317_p1, %p61_p0  ;;  %p775_p5 = scmp.ge.s32.totalorder %s1256_s17, 1 }
   0xd   : > { %p1332_p6 = por %p147_p3, %p61_p0  ;;  %p154_p7 = scmp.lt.s32.totalorder %s1256_s17, 3 }
   0xe   : > { %s1526_s1 = sld [smem:[#allocation11_spill]]  ;;  %s1258_s28 = smov [#allocation5]  }
   0xf   : > { %p1340_p8 = pnand %p775_p5, %p154_p7  ;;  %s169_s29 = sshll.u32 %s1258_s28, 4  ;;  %s170_s29 = int_to_ptr.vmem [resolvable:$true] %s169_s29 }
  0x10   : > { %p778_p11 = scmp.ge.s32.totalorder %s1256_s17, 2  ;;  %s1520_s30 = smov 64  }
  0x11   : > { %p1040_p9 = pneg %p1340_p8  ;;  %s1260_s4 = smov 4  }
  0x12   : > { %s39_s5 = sadd.s32 1, %s1252_s16  ;;  %s48_s6 = sadd.s32 1, %s1244_s14 }
  0x13   : > { %p1041_p10 = pnand %p1040_p9, %p1317_p1  ;;  %p41_p12 = scmp.ge.s32.totalorder %s39_s5, 2 }
  0x14   : > { %s167_s26 = sshll.u32 %s1526_s1, 4  ;;  %p55_p13 = scmp.ne.s32.totalorder %s1244_s14, %s1240_s13  ;;  %s168_s26 = int_to_ptr.hbm [resolvable:$true] %s167_s26 }
  0x15   : > { %1043 = dma.hbm_to_vmem [thread:$0]  (!%p1041_p10), %s168_s26, 1024, %s170_s29, [#allocation6], %s1520_s30, %s1520_s30, %s1260_s4  }
  0x16   : > { %p56_p0 = scmp.eq.s32.totalorder %s1256_s17, 0  ;;  %s1537_s5 = smov (%p41_p12, %s39_s5), 0 }
  0x17   : > { %p1365_p5 = por %p1321_p2, %p55_p13  ;;  %s43_s9 = ssub.s32 %s1252_s16, %s1537_s5 }
  0x18   : > { %p1359_p3 = por %p56_p0, %p55_p13  ;;  %p1053_p7 = scmp.lt.s32.totalorder %s1256_s17, 2 }
  0x19   : > { %p46_p9 = scmp.eq.s32.totalorder %s43_s9, 0  ;;  %s189_s10 = sand.u32 1, %s1244_s14  }
  0x1a   : > { %s779_s11 = sshll.u32 %s189_s10, 7  ;;  %s887_s19 = sshll.u32 %s1252_s16, 7 }
  0x1b   : > { %s1374_s18 = scalar_select %p46_p9, %s1244_s14, %s48_s6  }
  0x1c   : > { %s200_s26 = scalar_lea.hbm %s1516_s0, %s887_s19  ;;  %s193_s28 = scalar_lea.vmem [#allocation2], %s779_s11 }
  0x1d   : > { %s203_s29 = sshll.u32 %s193_s28, 4  ;;  %s201_s21 = sshll.u32 %s200_s26, 4  ;;  %s204_s29 = int_to_ptr.vmem [resolvable:$true] %s203_s29  ;;  %s202_s21 = int_to_ptr.hbm [resolvable:$true] %s201_s21 }
  0x1e   : > { %p1045_p2 = pnand %p1053_p7, %p1359_p3  ;;  %s190_s30 = scalar_lea.sflag [#allocation3], %s189_s10 }
  0x1f   : > { %s1530_s1 = smov 64   ;;  %215 = sbr.rel (%p1340_p8) target bundleno = 271 (0x10f), region = 32 }
  0x20   : > { %1047 = dma.hbm_to_vmem [thread:$0]  (!%p1045_p2), %s202_s21, 2048, %s204_s29, %s190_s30, %s1530_s1, %s1530_s1, %s1260_s4  }
  0x21   : > { %s1388_s6 = sand.u32 (!%p1340_p8), 1, %s1240_s13  }
  0x22   : > { %s783_s9 = sshll.u32 (!%p1340_p8), %s1388_s6, 7  ;;  %s218_s11 = scalar_lea.sflag (!%p1340_p8), [#allocation3], %s1388_s6 }
  0x23   : > { %s1394_s7 = scalar_lea.vmem (!%p1340_p8), [#allocation2], %s783_s9 }
  0x24   : > { %1223 = dma.done.wait (%p1327_p4), %s218_s11, 2048  }
  0x25   : > { %1225 = vsyncadd (%p1327_p4), %s218_s11, 4294965248 }
  0x26   : > { %1227 = dma.done.wait (%p1317_p1), [#allocation6], 1024  }
  0x27   : > { %1229 = vsyncadd (%p1317_p1), [#allocation6], 4294966272  ;;  %v911_v0 = vld [vmem:[#allocation5 + $0x38] sm:$0xff]  ;;  %v910_v1 = vld [vmem:[#allocation5 + $0x30] sm:$0xff]  ;;  %s1433_s22 = scalar_lea.vmem [#allocation7], %s783_s9  ;;  %s912_s27 = sshll.u32 %s1248_s15, 7 }
  0x28   : > { %454 = vmatpush.bf16.msra.mxu0 %v911_v0  ;;  %1008 = vmatpush.bf16.msra.mxu1 %v911_v0  ;;  %v909_v2 = vld [vmem:[#allocation5 + $0x28] sm:$0xff]  ;;  %v908_v3 = vld [vmem:[#allocation5 + $0x20] sm:$0xff]  ;;  %v907_v4 = vld [vmem:[#allocation5 + $0x18] sm:$0xff]  ;;  %s654_s10 = scalar_lea.hbm %s1519_s3, %s912_s27  ;;  %s655_s15 = sshll.u32 %s1433_s22, 4  ;;  %s656_s15 = int_to_ptr.vmem [resolvable:$true] %s655_s15 }
  0x29   : > { %1009 = vmatpush.bf16.msra.mxu2 %v911_v0  ;;  %1010 = vmatpush.bf16.msra.mxu3 %v911_v0  ;;  %v906_v5 = vld [vmem:[#allocation5 + $0x10] sm:$0xff]  ;;  %v905_v6 = vld [vmem:[#allocation5 + $0x8] sm:$0xff]  ;;  %v904_v7 = vld [vmem:[#allocation5] sm:$0xff]  ;;  %s657_s19 = sshll.u32 %s654_s10, 4  ;;  %s640_s24 = scalar_lea.sflag [#allocation4], %s1388_s6  ;;  %s658_s19 = int_to_ptr.hbm [resolvable:$true] %s657_s19 }
  0x2a   : > { %v888_v8 = vld [vmem:[%s1394_s7] sm:$0xff]  ;;  %v889_v12 = vld [vmem:[%s1394_s7 + $0x8] sm:$0xff]  ;;  %v890_v16 = vld [vmem:[%s1394_s7 + $0x10] sm:$0xff]  ;;  %s1184_s25 = sshra.s32 %s658_s19, 4  ;;  %s1190_s21 = scalar_lea.hbm %s1519_s3, 256  ;;  %s1185_s25 = int_to_ptr.hbm [resolvable:$true] %s1184_s25 }
  0x2b   : > { %v892_v9 = vld [vmem:[%s1394_s7 + $0x20] sm:$0xff]  ;;  %v893_v13 = vld [vmem:[%s1394_s7 + $0x28] sm:$0xff]  ;;  %v894_v17 = vld [vmem:[%s1394_s7 + $0x30] sm:$0xff]  ;;  %s1186_s26 = scalar_lea.hbm %s1185_s25, 128  ;;  %p1191_p10 = scmp.lt.s32.totalorder %s1185_s25, %s1519_s3 }
  0x2c   : > { %455 = vmatpush.bf16.msra.mxu0 %v910_v1  ;;  %1011 = vmatpush.bf16.msra.mxu1 %v910_v1  ;;  %v896_v10 = vld [vmem:[%s1394_s7 + $0x40] sm:$0xff]  ;;  %v897_v14 = vld [vmem:[%s1394_s7 + $0x48] sm:$0xff]  ;;  %v898_v18 = vld [vmem:[%s1394_s7 + $0x50] sm:$0xff]  ;;  %p1187_p1 = scmp.ne.s32.totalorder %s1185_s25, %s1186_s26  ;;  %p1192_p12 = scmp.lt.s32.totalorder %s1190_s21, %s1186_s26 }
  0x2d   : > { %1012 = vmatpush.bf16.msra.mxu2 %v910_v1  ;;  %1013 = vmatpush.bf16.msra.mxu3 %v910_v1  ;;  %v900_v11 = vld [vmem:[%s1394_s7 + $0x60] sm:$0xff]  ;;  %v901_v15 = vld [vmem:[%s1394_s7 + $0x68] sm:$0xff]  ;;  %v902_v19 = vld [vmem:[%s1394_s7 + $0x70] sm:$0xff] }
  0x2e   : > { %v891_v20 = vld [vmem:[%s1394_s7 + $0x18] sm:$0xff]  ;;  %v1423_v26 = vld [vmem:[%s1518_s2] ss:$0 sm:$0xff]  ;;  %p1188_p4 = pnand %p1187_p1, %p1365_p5  ;;  %p1193_p13 = por %p1192_p12, %p1191_p10 }
  0x2f   : > { %v895_v21 = vld [vmem:[%s1394_s7 + $0x38] sm:$0xff] }
  0x30   : > { %456 = vmatpush.bf16.msra.mxu0 %v909_v2  ;;  %1014 = vmatpush.bf16.msra.mxu1 %v909_v2  ;;  %v899_v22 = vld [vmem:[%s1394_s7 + $0x58] sm:$0xff]  ;;  %p1189_p8 = pneg %p1188_p4 }
  0x31   : > { %1015 = vmatpush.bf16.msra.mxu2 %v909_v2  ;;  %1016 = vmatpush.bf16.msra.mxu3 %v909_v2  ;;  %v903_v23 = vld [vmem:[%s1394_s7 + $0x78] sm:$0xff] }
  0x32   : > { %p1194_p0 = pnand %p1193_p13, %p1189_p8 }
  0x34   : > { %457 = vmatpush.bf16.msra.mxu0 %v908_v3  ;;  %1017 = vmatpush.bf16.msra.mxu1 %v908_v3 }
  0x35   : > { %1018 = vmatpush.bf16.msra.mxu2 %v908_v3  ;;  %1019 = vmatpush.bf16.msra.mxu3 %v908_v3 }
  0x38   : > { %458 = vmatpush.bf16.msra.mxu0 %v907_v4  ;;  %1020 = vmatpush.bf16.msra.mxu1 %v907_v4 }
  0x39   : > { %1021 = vmatpush.bf16.msra.mxu2 %v907_v4  ;;  %1022 = vmatpush.bf16.msra.mxu3 %v907_v4 }
  0x3c   : > { %459 = vmatpush.bf16.msra.mxu0 %v906_v5  ;;  %1023 = vmatpush.bf16.msra.mxu1 %v906_v5 }
  0x3d   : > { %1024 = vmatpush.bf16.msra.mxu2 %v906_v5  ;;  %1025 = vmatpush.bf16.msra.mxu3 %v906_v5 }
  0x40   : > { %460 = vmatpush.bf16.msra.mxu0 %v905_v6  ;;  %1026 = vmatpush.bf16.msra.mxu1 %v905_v6 }
  0x41   : > { %1027 = vmatpush.bf16.msra.mxu2 %v905_v6  ;;  %1028 = vmatpush.bf16.msra.mxu3 %v905_v6 }
  0x44   : > { %461 = vmatpush.bf16.msra.mxu0 %v904_v7  ;;  %1029 = vmatpush.bf16.msra.mxu1 %v904_v7 }
  0x45   : > { %1030 = vmatpush.bf16.msra.mxu2 %v904_v7  ;;  %1031 = vmatpush.bf16.msra.mxu3 %v904_v7 }
  0x47   : > { %462 = vmatmul.bf16.vlgmr.msra.gmra.mxu0 %v888_v8  ;;  %482 = vmatmul.bf16.vlgmr.msra.gmra.mxu1 %v892_v9 }
  0x48   : > { %502 = vmatmul.bf16.vlgmr.msra.gmra.mxu2 %v896_v10  ;;  %522 = vmatmul.bf16.vlgmr.msra.gmra.mxu3 %v900_v11 }
  0x57   : > { %467 = vmatmul.bf16.gmra.mxu0 %v889_v12  ;;  %487 = vmatmul.bf16.gmra.mxu1 %v893_v13 }
  0x58   : > { %507 = vmatmul.bf16.gmra.mxu2 %v897_v14  ;;  %527 = vmatmul.bf16.gmra.mxu3 %v901_v15 }
  0x67   : > { %472 = vmatmul.bf16.gmra.mxu0 %v890_v16  ;;  %492 = vmatmul.bf16.gmra.mxu1 %v894_v17 }
  0x68   : > { %512 = vmatmul.bf16.gmra.mxu2 %v898_v18  ;;  %532 = vmatmul.bf16.gmra.mxu3 %v902_v19 }
  0x77   : > { %477 = vmatmul.bf16.gmra.mxu0 %v891_v20  ;;  %497 = vmatmul.bf16.gmra.mxu1 %v895_v21 }
  0x78   : > { %517 = vmatmul.bf16.gmra.mxu2 %v899_v22  ;;  %537 = vmatmul.bf16.gmra.mxu3 %v903_v23 }
  0xc4   : > { %v463_v24 = vpop.f32.mrf.mxu0  ;;  %v483_v25 = vpop.f32.mrf.mxu1 }
  0xc5   : > { %v464_v27 = vadd.f32 %v1423_v26, %v463_v24  ;;  %v484_v28 = vadd.f32 %v1423_v26, %v483_v25 }
  0xc7   : > { %v543_v35 = vmax.f32 %v464_v27, 0.0  ;;  %v551_v36 = vmax.f32 %v484_v28, 0.0 }
  0xcb   : > { %v503_v29 = vpop.f32.mrf.mxu2  ;;  %v523_v30 = vpop.f32.mrf.mxu3 }
  0xcc   : > { %v465_v31 = vpop.f32.mrf.mxu0  ;;  %v485_v32 = vpop.f32.mrf.mxu1  ;;  %v504_v41 = vadd.f32 %v1423_v26, %v503_v29  ;;  %v524_v42 = vadd.f32 %v1423_v26, %v523_v30 }
  0xcd   : > { %v466_v33 = vadd.f32 %v1423_v26, %v465_v31  ;;  %v486_v34 = vadd.f32 %v1423_v26, %v485_v32 }
  0xce   : > { %v559_v49 = vmax.f32 %v504_v41, 0.0  ;;  %v567_v50 = vmax.f32 %v524_v42, 0.0 }
  0xcf   : > { %v544_v37 = vmax.f32 %v466_v33, 0.0  ;;  %v552_v38 = vmax.f32 %v486_v34, 0.0 }
  0xd1   : > { %v916_v39 = vpack.c.bf16 %v544_v37, %v543_v35  ;;  %v936_v40 = vpack.c.bf16 %v552_v38, %v551_v36 }
  0xd3   : > { %917 = vst [vmem:[%s1433_s22] sm:$0xff] %v916_v39   ;;  %v505_v43 = vpop.f32.mrf.mxu2  ;;  %v525_v44 = vpop.f32.mrf.mxu3 }
  0xd4   : > { %996 = vst [vmem:[%s1433_s22 + $0x20] sm:$0xff] %v936_v40   ;;  %v506_v45 = vadd.f32 %v1423_v26, %v505_v43  ;;  %v526_v46 = vadd.f32 %v1423_v26, %v525_v44  ;;  %v468_v47 = vpop.f32.mrf.mxu0  ;;  %v488_v48 = vpop.f32.mrf.mxu1 }
  0xd5   : > { %v469_v55 = vadd.f32 %v1423_v26, %v468_v47  ;;  %v489_v56 = vadd.f32 %v1423_v26, %v488_v48 }
  0xd6   : > { %v560_v51 = vmax.f32 %v506_v45, 0.0  ;;  %v568_v52 = vmax.f32 %v526_v46, 0.0 }
  0xd7   : > { %v545_v63 = vmax.f32 %v469_v55, 0.0  ;;  %v553_v0 = vmax.f32 %v489_v56, 0.0 }
  0xd8   : > { %v956_v53 = vpack.c.bf16 %v560_v51, %v559_v49  ;;  %v976_v54 = vpack.c.bf16 %v568_v52, %v567_v50 }
  0xda   : > { %1000 = vst [vmem:[%s1433_s22 + $0x40] sm:$0xff] %v956_v53  }
  0xdb   : > { %1004 = vst [vmem:[%s1433_s22 + $0x60] sm:$0xff] %v976_v54   ;;  %v508_v57 = vpop.f32.mrf.mxu2  ;;  %v528_v58 = vpop.f32.mrf.mxu3 }
  0xdc   : > { %v470_v59 = vpop.f32.mrf.mxu0  ;;  %v490_v60 = vpop.f32.mrf.mxu1  ;;  %v509_v5 = vadd.f32 %v1423_v26, %v508_v57  ;;  %v529_v6 = vadd.f32 %v1423_v26, %v528_v58 }
  0xdd   : > { %v471_v61 = vadd.f32 %v1423_v26, %v470_v59  ;;  %v491_v62 = vadd.f32 %v1423_v26, %v490_v60 }
  0xde   : > { %v561_v13 = vmax.f32 %v509_v5, 0.0  ;;  %v569_v14 = vmax.f32 %v529_v6, 0.0 }
  0xdf   : > { %v546_v1 = vmax.f32 %v471_v61, 0.0  ;;  %v554_v2 = vmax.f32 %v491_v62, 0.0 }
  0xe1   : > { %v921_v3 = vpack.c.bf16 %v546_v1, %v545_v63  ;;  %v941_v4 = vpack.c.bf16 %v554_v2, %v553_v0 }
  0xe3   : > { %993 = vst [vmem:[%s1433_s22 + $0x8] sm:$0xff] %v921_v3   ;;  %v510_v7 = vpop.f32.mrf.mxu2  ;;  %v530_v8 = vpop.f32.mrf.mxu3 }
  0xe4   : > { %997 = vst [vmem:[%s1433_s22 + $0x28] sm:$0xff] %v941_v4   ;;  %v511_v9 = vadd.f32 %v1423_v26, %v510_v7  ;;  %v531_v10 = vadd.f32 %v1423_v26, %v530_v8  ;;  %v473_v11 = vpop.f32.mrf.mxu0  ;;  %v493_v12 = vpop.f32.mrf.mxu1 }
  0xe5   : > { %v474_v19 = vadd.f32 %v1423_v26, %v473_v11  ;;  %v494_v20 = vadd.f32 %v1423_v26, %v493_v12 }
  0xe6   : > { %v562_v15 = vmax.f32 %v511_v9, 0.0  ;;  %v570_v16 = vmax.f32 %v531_v10, 0.0 }
  0xe7   : > { %v547_v28 = vmax.f32 %v474_v19, 0.0  ;;  %v555_v29 = vmax.f32 %v494_v20, 0.0 }
  0xe8   : > { %v961_v17 = vpack.c.bf16 %v562_v15, %v561_v13  ;;  %v981_v18 = vpack.c.bf16 %v570_v16, %v569_v14 }
  0xea   : > { %1001 = vst [vmem:[%s1433_s22 + $0x48] sm:$0xff] %v961_v17  }
  0xeb   : > { %1005 = vst [vmem:[%s1433_s22 + $0x68] sm:$0xff] %v981_v18   ;;  %v513_v21 = vpop.f32.mrf.mxu2  ;;  %v533_v22 = vpop.f32.mrf.mxu3 }
  0xec   : > { %v475_v23 = vpop.f32.mrf.mxu0  ;;  %v495_v24 = vpop.f32.mrf.mxu1  ;;  %v514_v34 = vadd.f32 %v1423_v26, %v513_v21  ;;  %v534_v35 = vadd.f32 %v1423_v26, %v533_v22 }
  0xed   : > { %v476_v25 = vadd.f32 %v1423_v26, %v475_v23  ;;  %v496_v27 = vadd.f32 %v1423_v26, %v495_v24 }
  0xee   : > { %v563_v42 = vmax.f32 %v514_v34, 0.0  ;;  %v571_v43 = vmax.f32 %v534_v35, 0.0 }
  0xef   : > { %v548_v30 = vmax.f32 %v476_v25, 0.0  ;;  %v556_v31 = vmax.f32 %v496_v27, 0.0 }
  0xf1   : > { %v926_v32 = vpack.c.bf16 %v548_v30, %v547_v28  ;;  %v946_v33 = vpack.c.bf16 %v556_v31, %v555_v29 }
  0xf3   : > { %994 = vst [vmem:[%s1433_s22 + $0x10] sm:$0xff] %v926_v32   ;;  %v515_v36 = vpop.f32.mrf.mxu2  ;;  %v535_v37 = vpop.f32.mrf.mxu3 }
  0xf4   : > { %998 = vst [vmem:[%s1433_s22 + $0x30] sm:$0xff] %v946_v33   ;;  %v516_v38 = vadd.f32 %v1423_v26, %v515_v36  ;;  %v536_v39 = vadd.f32 %v1423_v26, %v535_v37  ;;  %v478_v40 = vpop.f32.mrf.mxu0  ;;  %v498_v41 = vpop.f32.mrf.mxu1 }
  0xf5   : > { %v479_v48 = vadd.f32 %v1423_v26, %v478_v40  ;;  %v499_v49 = vadd.f32 %v1423_v26, %v498_v41 }
  0xf6   : > { %v564_v44 = vmax.f32 %v516_v38, 0.0  ;;  %v572_v45 = vmax.f32 %v536_v39, 0.0 }
  0xf7   : > { %v549_v56 = vmax.f32 %v479_v48, 0.0  ;;  %v557_v57 = vmax.f32 %v499_v49, 0.0 }
  0xf8   : > { %v966_v46 = vpack.c.bf16 %v564_v44, %v563_v42  ;;  %v986_v47 = vpack.c.bf16 %v572_v45, %v571_v43 }
  0xfa   : > { %1002 = vst [vmem:[%s1433_s22 + $0x50] sm:$0xff] %v966_v46  }
  0xfb   : > { %1006 = vst [vmem:[%s1433_s22 + $0x70] sm:$0xff] %v986_v47   ;;  %v518_v50 = vpop.f32.mrf.mxu2  ;;  %v538_v51 = vpop.f32.mrf.mxu3 }
  0xfc   : > { %v480_v52 = vpop.f32.mrf.mxu0  ;;  %v500_v53 = vpop.f32.mrf.mxu1  ;;  %v519_v62 = vadd.f32 %v1423_v26, %v518_v50  ;;  %v539_v63 = vadd.f32 %v1423_v26, %v538_v51 }
  0xfd   : > { %v481_v54 = vadd.f32 %v1423_v26, %v480_v52  ;;  %v501_v55 = vadd.f32 %v1423_v26, %v500_v53 }
  0xfe   : > { %v565_v4 = vmax.f32 %v519_v62, 0.0  ;;  %v573_v5 = vmax.f32 %v539_v63, 0.0 }
  0xff   : > { %v550_v58 = vmax.f32 %v481_v54, 0.0  ;;  %v558_v59 = vmax.f32 %v501_v55, 0.0 }
 0x101   : > { %v931_v60 = vpack.c.bf16 %v550_v58, %v549_v56  ;;  %v951_v61 = vpack.c.bf16 %v558_v59, %v557_v57 }
 0x103   : > { %995 = vst [vmem:[%s1433_s22 + $0x18] sm:$0xff] %v931_v60   ;;  %v520_v0 = vpop.f32.mrf.mxu2  ;;  %v540_v1 = vpop.f32.mrf.mxu3 }
 0x104   : > { %999 = vst [vmem:[%s1433_s22 + $0x38] sm:$0xff] %v951_v61   ;;  %v521_v2 = vadd.f32 %v1423_v26, %v520_v0  ;;  %v541_v3 = vadd.f32 %v1423_v26, %v540_v1 }
 0x106   : > { %v566_v6 = vmax.f32 %v521_v2, 0.0  ;;  %v574_v7 = vmax.f32 %v541_v3, 0.0 }
 0x108   : > { %v971_v8 = vpack.c.bf16 %v566_v6, %v565_v4  ;;  %v991_v9 = vpack.c.bf16 %v574_v7, %v573_v5 }
 0x10a   : > { %1003 = vst [vmem:[%s1433_s22 + $0x58] sm:$0xff] %v971_v8  }
 0x10b   : > { %1007 = vst [vmem:[%s1433_s22 + $0x78] sm:$0xff] %v991_v9  }
 0x10c   : > { %1197 = shalt.err (!%p1194_p0)
}
 0x10d   : > { %s1261_s6 = smov 64   ;;  %s1262_s7 = smov 4  }
 0x10e   : > { %1038 = dma.vmem_to_hbm [thread:$0]  (%p1365_p5), %s656_s15, 2048, %s658_s19, %s640_s24, %s1261_s6, %s1261_s6, %s1262_s7  }
 0x10f PF: > { %s672_s1 = sand.u32 1, %s1236_s12   ;;  %p1049_p3 = pnand %p778_p11, %p1332_p6 }
 0x110   : > { %s673_s20 = scalar_lea.sflag [#allocation4], %s672_s1 }
 0x111   : > { %p1050_p7 = pneg %p1049_p3 }
 0x113   : > { %1231 = dma.done.wait (%p1050_p7), %s673_s20, 2048  }
 0x114   : > { %1233 = vsyncadd (%p1050_p7), %s673_s20, 4294965248  ;;  %s20_s17 = sadd.s32 1, %s1256_s17   ;;  %s1531_s12 = smov %s1240_s13 }
 0x115   : > { %p17_p9 = scmp.ge.s32.totalorder %s20_s17, 4   ;;  %s1532_s13 = smov %s1244_s14 }
 0x116   : > { %s1533_s14 = smov %s1374_s18  ;;  %s1534_s15 = smov %s1252_s16 }
 0x117   : > { %s1535_s16 = smov %s1537_s5  ;;  %19 = sbr.rel (!%p17_p9) target bundleno = 9 (0x9), region = 85 }
 0x11c   :  { %679 = vsyncpa [#allocation3], 1 }
 0x11d   :  { %681 = vsyncpa [#allocation3 + $0x1], 1 }
 0x11e   :  { %682 = vsyncpa [#allocation6], 1 }
 0x11f   :  { %683 = vsyncpa [#allocation4], 1 }
 0x120   :  { %685 = vsyncpa [#allocation4 + $0x1], 1 }

</bundles_post_ra>
